<compile_context>
chip_gen: v7x
topology: tpu7x:2x2x1
jax: 0.10.0
libtpu: 0.0.40
codegen_flags: <defaults>
</compile_context>

<pallas_src>
import jax
import jax.numpy as jnp
from jax.experimental import pallas as pl
from jax.experimental.pallas import tpu as pltpu


# ----------------------------- fused LSTM + head kernel -----------------------------
def fused_lstm_head_kernel(x_ref, w_ih_ref, b_ref, w_hh_ref,
                           w1_ref, b1_ref, w2_ref, b2_ref,
                           out_ref, gx_ref):
    """x_ref: (T, tb, E) embeddings for one batch chunk (time-major).

    gx_ref: VMEM scratch (T*tb, 4H) holding the hoisted input projection.
    out_ref: (tb, 1) final prediction for this chunk (single store at the end).
    """
    T, tb, E = x_ref.shape
    H = w_hh_ref.shape[0]

    # 1) Hoisted input projection for ALL time steps of this chunk: one big MXU
    #    matmul.  The (T, tb, E) -> (T*tb, E) reshape is layout-preserving
    #    (tb is sublane-aligned, last dim unchanged).
    x2 = x_ref[...].reshape(T * tb, E)
    gx_ref[...] = (
        jnp.dot(x2, w_ih_ref[...], preferred_element_type=jnp.float32)
        + b_ref[...]
    )

    # Loop invariants hoisted out of the recurrence (broadcasts are not CSE'd).
    w_hh = w_hh_ref[...]
    lane = jax.lax.broadcasted_iota(jnp.int32, (tb, 4 * H), 1)
    g_cols = (lane >= 2 * H) & (lane < 3 * H)   # tanh columns (g gate)

    # 2) Serial recurrence inside the kernel; per step only h @ W_hh + one tanh.
    def step(t, carry):
        h, c = carry
        start = pl.multiple_of(t * tb, tb)               # sublane-aligned (tb % 8 == 0)
        gates = gx_ref[pl.ds(start, tb), :] + jnp.dot(
            h, w_hh, preferred_element_type=jnp.float32)  # (tb, 4H)
        # Single full-vreg EUP transcendental:
        #   sigmoid(x) = 0.5 * tanh(0.5 * x) + 0.5, selected by the g-gate lane mask.
        y = jnp.tanh(jnp.where(g_cols, gates, 0.5 * gates))
        act = jnp.where(g_cols, y, 0.5 * y + 0.5)
        i_g = act[:, 0 * H:1 * H]
        f_g = act[:, 1 * H:2 * H]
        g_g = act[:, 2 * H:3 * H]
        o_g = act[:, 3 * H:4 * H]
        c = f_g * c + i_g * g_g
        h = o_g * jnp.tanh(c)
        return h, c

    h0 = jnp.zeros((tb, H), jnp.float32)
    unroll = True if T <= 32 else 8   # full unroll only for short sequences
    h_last, _ = jax.lax.fori_loop(0, T, step, (h0, h0), unroll=unroll)

    # 3) Fused classification head: fc1 -> fc2 -> sigmoid*9 + 1.
    z1 = jnp.dot(h_last, w1_ref[...], preferred_element_type=jnp.float32) + b1_ref[...]
    z2 = jnp.dot(z1, w2_ref[...], preferred_element_type=jnp.float32) + b2_ref[...]
    out_ref[...] = (jax.nn.sigmoid(z2) * 9.0 + 1.0).astype(out_ref.dtype)


def _pick_batch_tile(B):
    """Chunk the batch so v7x's two TensorCores each get independent work.

    Constraint: tile must be a multiple of 8 (sublane) or equal to B.
    """
    if B % 16 == 0:
        return B // 2
    return B


def lstm_classifier_pallas(embeds, params):
    T, B, E = embeds.shape
    H = params["w_hh"].shape[0]
    F1 = params["w1"].shape[1]          # 10 * label_size
    tb = _pick_batch_tile(B)
    grid = (B // tb,)

    return pl.pallas_call(
        fused_lstm_head_kernel,
        out_shape=jax.ShapeDtypeStruct((B, 1), jnp.float32),
        grid_spec=pltpu.PrefetchScalarGridSpec(
            num_scalar_prefetch=0,
            grid=grid,
            in_specs=[
                pl.BlockSpec((T, tb, E), lambda c: (0, c, 0)),      # x (per-chunk)
                pl.BlockSpec((E, 4 * H), lambda c: (0, 0)),         # W_ih
                pl.BlockSpec((1, 4 * H), lambda c: (0, 0)),         # b_lstm
                pl.BlockSpec((H, 4 * H), lambda c: (0, 0)),         # W_hh
                pl.BlockSpec((H, F1), lambda c: (0, 0)),            # fc1 W
                pl.BlockSpec((1, F1), lambda c: (0, 0)),            # fc1 b
                pl.BlockSpec((F1, 1), lambda c: (0, 0)),            # fc2 W
                pl.BlockSpec((1, 1), lambda c: (0, 0)),             # fc2 b
            ],
            out_specs=pl.BlockSpec((tb, 1), lambda c: (c, 0)),
            scratch_shapes=[pltpu.VMEM((T * tb, 4 * H), jnp.float32)],
        ),
        compiler_params=pltpu.CompilerParams(
            dimension_semantics=("parallel",)),
    )(embeds, params["w_ih"], params["b_lstm"], params["w_hh"],
      params["w1"], params["b1"], params["w2"], params["b2"])


# ----------------------------- full forward -----------------------------
@jax.jit
def lstm_classifier_forward(sentence, params):
    # Embedding lookup is glue (gather), done in plain JAX; dropout_embed = identity.
    embeds = jnp.take(params["emb"], sentence, axis=0)          # (T, B, E)
    return lstm_classifier_pallas(embeds, params)               # (B, 1)


# ----------------------------- pure-JAX reference (for verification) -----------------------------
def reference_forward(sentence, params):
    embeds = jnp.take(params["emb"], sentence, axis=0)
    T, B, E = embeds.shape
    H = params["w_hh"].shape[0]

    def step(carry, x_t):
        h, c = carry
        gates = x_t @ params["w_ih"] + h @ params["w_hh"] + params["b_lstm"][0]
        i_g = jax.nn.sigmoid(gates[:, 0 * H:1 * H])
        f_g = jax.nn.sigmoid(gates[:, 1 * H:2 * H])
        g_g = jnp.tanh(gates[:, 2 * H:3 * H])
        o_g = jax.nn.sigmoid(gates[:, 3 * H:4 * H])
        c = f_g * c + i_g * g_g
        h = o_g * jnp.tanh(c)
        return (h, c), h

    h0 = jnp.zeros((B, H), jnp.float32)
    (h_last, _), _ = jax.lax.scan(step, (h0, h0), embeds)
    z1 = h_last @ params["w1"] + params["b1"][0]
    z2 = z1 @ params["w2"] + params["b2"][0]
    return jax.nn.sigmoid(z2) * 9.0 + 1.0


# ----------------------------- parameter init -----------------------------
def init_params(key, vocab_size, embedding_dim, hidden_dim, label_size):
    ks = jax.random.split(key, 8)
    H = hidden_dim
    bound = 1.0 / jnp.sqrt(H)

    def uni(k, shape, b):
        return jax.random.uniform(k, shape, jnp.float32, -b, b)

    return {
        "emb": jax.random.normal(ks[0], (vocab_size, embedding_dim), jnp.float32),
        "w_ih": uni(ks[1], (embedding_dim, 4 * H), bound),
        "w_hh": uni(ks[2], (H, 4 * H), bound),
        # b_ih + b_hh folded into one bias (sum them when importing PyTorch weights).
        "b_lstm": uni(ks[3], (1, 4 * H), bound),
        "w1": uni(ks[4], (H, 10 * label_size), 1.0 / jnp.sqrt(H)),
        "b1": uni(ks[5], (1, 10 * label_size), 1.0 / jnp.sqrt(H)),
        "w2": uni(ks[6], (10 * label_size, 1), 1.0 / jnp.sqrt(10 * label_size)),
        "b2": uni(ks[7], (1, 1), 1.0 / jnp.sqrt(10 * label_size)),
    }


if __name__ == "__main__":
    # Small shapes consistent with the module (cnn=False path).
    T, B = 8, 8                 # seq len, batch (B multiple of 8 -> sublane aligned)
    vocab_size = 100
    embedding_dim = 32
    hidden_dim = 32             # 4H = 128 -> lane-dense gate tile
    label_size = 4

    key = jax.random.PRNGKey(0)
    k_tok, k_par = jax.random.split(key)

    sentence = jax.random.randint(k_tok, (T, B), 0, vocab_size, dtype=jnp.int32)
    params = init_params(k_par, vocab_size, embedding_dim, hidden_dim, label_size)

    out = lstm_classifier_forward(sentence, params)
    out = jax.block_until_ready(out)

    ref = reference_forward(sentence, params)
    assert out.shape == (B, 1), out.shape
    # Tolerance re-validated for the tanh-derived sigmoid in the recurrence.
    assert jnp.allclose(out, ref, atol=1e-4, rtol=1e-4), (out, ref)

    print("KERNEL_OK")
</pallas_src>

<mosaic_0001>
module attributes {stable_mosaic.version = 11 : i64} {
  func.func @fused_lstm_head_kernel(%arg0: i32, %arg1: memref<8x8x32xf32, #tpu.memory_space<vmem>>, %arg2: memref<32x128xf32, #tpu.memory_space<vmem>>, %arg3: memref<1x128xf32, #tpu.memory_space<vmem>>, %arg4: memref<32x128xf32, #tpu.memory_space<vmem>>, %arg5: memref<32x40xf32, #tpu.memory_space<vmem>>, %arg6: memref<1x40xf32, #tpu.memory_space<vmem>>, %arg7: memref<40x1xf32, #tpu.memory_space<vmem>>, %arg8: memref<1x1xf32, #tpu.memory_space<vmem>>, %arg9: memref<8x1xf32, #tpu.memory_space<vmem>>, %arg10: memref<64x128xf32, #tpu.memory_space<vmem>>) attributes {dimension_semantics = [#tpu.dimension_semantics<parallel>], iteration_bounds = array<i64: 1>, scalar_prefetch = 0 : i64, scratch_operands = 1 : i64, tpu.core_type = #tpu.core_type<tc>, window_params = [{transform_indices = @transform_0, window_bounds = array<i64: 8, 8, 32>}, {pipeline_mode = #tpu.pipeline_mode<synchronous>, transform_indices = @transform_1, window_bounds = array<i64: 32, 128>}, {pipeline_mode = #tpu.pipeline_mode<synchronous>, transform_indices = @transform_2, window_bounds = array<i64: 1, 128>}, {pipeline_mode = #tpu.pipeline_mode<synchronous>, transform_indices = @transform_3, window_bounds = array<i64: 32, 128>}, {pipeline_mode = #tpu.pipeline_mode<synchronous>, transform_indices = @transform_4, window_bounds = array<i64: 32, 40>}, {pipeline_mode = #tpu.pipeline_mode<synchronous>, transform_indices = @transform_5, window_bounds = array<i64: 1, 40>}, {pipeline_mode = #tpu.pipeline_mode<synchronous>, transform_indices = @transform_6, window_bounds = array<i64: 40, 1>}, {pipeline_mode = #tpu.pipeline_mode<synchronous>, transform_indices = @transform_7, window_bounds = array<i64: 1, 1>}, {transform_indices = @transform_8, window_bounds = array<i64: 8, 1>}]} {
    %c0 = arith.constant 0 : index
    %c0_0 = arith.constant 0 : index
    %c0_1 = arith.constant 0 : index
    %0 = vector.load %arg1[%c0, %c0_0, %c0_1] : memref<8x8x32xf32, #tpu.memory_space<vmem>>, vector<8x8x32xf32>
    %1 = vector.shape_cast %0 : vector<8x8x32xf32> to vector<64x32xf32>
    %c0_2 = arith.constant 0 : index
    %c0_3 = arith.constant 0 : index
    %2 = vector.load %arg2[%c0_2, %c0_3] : memref<32x128xf32, #tpu.memory_space<vmem>>, vector<32x128xf32>
    %cst = arith.constant dense<0.000000e+00> : vector<64x128xf32>
    %3 = tpu.matmul %1, %2, %cst {dimension_numbers = #tpu.dot_dimension_numbers<[1], [0], [0], [1], [0, 0, 1, 1], [], []>} : vector<64x32xf32>, vector<32x128xf32>, vector<64x128xf32> -> vector<64x128xf32>
    %c0_4 = arith.constant 0 : index
    %c0_5 = arith.constant 0 : index
    %4 = vector.load %arg3[%c0_4, %c0_5] : memref<1x128xf32, #tpu.memory_space<vmem>>, vector<1x128xf32>
    %5 = vector.broadcast %4 : vector<1x128xf32> to vector<64x128xf32>
    %6 = arith.addf %3, %5 : vector<64x128xf32>
    %c0_6 = arith.constant 0 : index
    %c0_7 = arith.constant 0 : index
    %7 = vector.load %arg10[%c0_6, %c0_7] : memref<64x128xf32, #tpu.memory_space<vmem>>, vector<64x128xf32>
    tpu.vector_store %arg10[%c0_6, %c0_7], %6 {strides = array<i32>} : memref<64x128xf32, #tpu.memory_space<vmem>>, vector<64x128xf32>,
    %c0_8 = arith.constant 0 : index
    %c0_9 = arith.constant 0 : index
    %8 = vector.load %arg4[%c0_8, %c0_9] : memref<32x128xf32, #tpu.memory_space<vmem>>, vector<32x128xf32>
    %9 = tpu.iota {dimensions = array<i32: 1>} : vector<8x128xi32>
    %c64_i32 = arith.constant 64 : i32
    %10 = vector.broadcast %c64_i32 : i32 to vector<8x128xi32>
    %11 = arith.cmpi sge, %9, %10 : vector<8x128xi32>
    %c96_i32 = arith.constant 96 : i32
    %12 = vector.broadcast %c96_i32 : i32 to vector<8x128xi32>
    %13 = arith.cmpi slt, %9, %12 : vector<8x128xi32>
    %14 = arith.andi %11, %13 : vector<8x128xi1>
    %cst_10 = arith.constant 0.000000e+00 : f32
    %15 = vector.broadcast %cst_10 : f32 to vector<8x32xf32>
    %c0_i32 = arith.constant 0 : i32
    %c8_i32 = arith.constant 8 : i32
    %16 = arith.muli %c0_i32, %c8_i32 : i32
    %17 = tpu.assume_multiple %16, 8 : i32
    %18 = arith.index_cast %17 : i32 to index
    %c0_11 = arith.constant 0 : index
    %19 = vector.load %arg10[%18, %c0_11] : memref<64x128xf32, #tpu.memory_space<vmem>>, vector<8x128xf32>
    %cst_12 = arith.constant dense<0.000000e+00> : vector<8x128xf32>
    %20 = tpu.matmul %15, %8, %cst_12 {dimension_numbers = #tpu.dot_dimension_numbers<[1], [0], [0], [1], [0, 0, 1, 1], [], []>} : vector<8x32xf32>, vector<32x128xf32>, vector<8x128xf32> -> vector<8x128xf32>
    %21 = arith.addf %19, %20 : vector<8x128xf32>
    %cst_13 = arith.constant 5.000000e-01 : f32
    %22 = vector.broadcast %cst_13 : f32 to vector<8x128xf32>
    %23 = arith.mulf %22, %21 : vector<8x128xf32>
    %24 = arith.select %14, %21, %23 : vector<8x128xi1>, vector<8x128xf32>
    %25 = math.tanh %24 : vector<8x128xf32>
    %cst_14 = arith.constant 5.000000e-01 : f32
    %26 = vector.broadcast %cst_14 : f32 to vector<8x128xf32>
    %27 = arith.mulf %26, %25 : vector<8x128xf32>
    %cst_15 = arith.constant 5.000000e-01 : f32
    %28 = vector.broadcast %cst_15 : f32 to vector<8x128xf32>
    %29 = arith.addf %27, %28 : vector<8x128xf32>
    %30 = arith.select %14, %25, %29 : vector<8x128xi1>, vector<8x128xf32>
    %31 = vector.extract_strided_slice %30 {offsets = [0, 0], sizes = [8, 32], strides = [1, 1]} : vector<8x128xf32> to vector<8x32xf32>
    %32 = vector.extract_strided_slice %30 {offsets = [0, 32], sizes = [8, 32], strides = [1, 1]} : vector<8x128xf32> to vector<8x32xf32>
    %33 = vector.extract_strided_slice %30 {offsets = [0, 64], sizes = [8, 32], strides = [1, 1]} : vector<8x128xf32> to vector<8x32xf32>
    %34 = vector.extract_strided_slice %30 {offsets = [0, 96], sizes = [8, 32], strides = [1, 1]} : vector<8x128xf32> to vector<8x32xf32>
    %35 = arith.mulf %32, %15 : vector<8x32xf32>
    %36 = arith.mulf %31, %33 : vector<8x32xf32>
    %37 = arith.addf %35, %36 : vector<8x32xf32>
    %38 = math.tanh %37 : vector<8x32xf32>
    %39 = arith.mulf %34, %38 : vector<8x32xf32>
    %c1_i32 = arith.constant 1 : i32
    %c8_i32_16 = arith.constant 8 : i32
    %40 = arith.muli %c1_i32, %c8_i32_16 : i32
    %41 = tpu.assume_multiple %40, 8 : i32
    %42 = arith.index_cast %41 : i32 to index
    %c0_17 = arith.constant 0 : index
    %43 = vector.load %arg10[%42, %c0_17] : memref<64x128xf32, #tpu.memory_space<vmem>>, vector<8x128xf32>
    %cst_18 = arith.constant dense<0.000000e+00> : vector<8x128xf32>
    %44 = tpu.matmul %39, %8, %cst_18 {dimension_numbers = #tpu.dot_dimension_numbers<[1], [0], [0], [1], [0, 0, 1, 1], [], []>} : vector<8x32xf32>, vector<32x128xf32>, vector<8x128xf32> -> vector<8x128xf32>
    %45 = arith.addf %43, %44 : vector<8x128xf32>
    %cst_19 = arith.constant 5.000000e-01 : f32
    %46 = vector.broadcast %cst_19 : f32 to vector<8x128xf32>
    %47 = arith.mulf %46, %45 : vector<8x128xf32>
    %48 = arith.select %14, %45, %47 : vector<8x128xi1>, vector<8x128xf32>
    %49 = math.tanh %48 : vector<8x128xf32>
    %cst_20 = arith.constant 5.000000e-01 : f32
    %50 = vector.broadcast %cst_20 : f32 to vector<8x128xf32>
    %51 = arith.mulf %50, %49 : vector<8x128xf32>
    %cst_21 = arith.constant 5.000000e-01 : f32
    %52 = vector.broadcast %cst_21 : f32 to vector<8x128xf32>
    %53 = arith.addf %51, %52 : vector<8x128xf32>
    %54 = arith.select %14, %49, %53 : vector<8x128xi1>, vector<8x128xf32>
    %55 = vector.extract_strided_slice %54 {offsets = [0, 0], sizes = [8, 32], strides = [1, 1]} : vector<8x128xf32> to vector<8x32xf32>
    %56 = vector.extract_strided_slice %54 {offsets = [0, 32], sizes = [8, 32], strides = [1, 1]} : vector<8x128xf32> to vector<8x32xf32>
    %57 = vector.extract_strided_slice %54 {offsets = [0, 64], sizes = [8, 32], strides = [1, 1]} : vector<8x128xf32> to vector<8x32xf32>
    %58 = vector.extract_strided_slice %54 {offsets = [0, 96], sizes = [8, 32], strides = [1, 1]} : vector<8x128xf32> to vector<8x32xf32>
    %59 = arith.mulf %56, %37 : vector<8x32xf32>
    %60 = arith.mulf %55, %57 : vector<8x32xf32>
    %61 = arith.addf %59, %60 : vector<8x32xf32>
    %62 = math.tanh %61 : vector<8x32xf32>
    %63 = arith.mulf %58, %62 : vector<8x32xf32>
    %c2_i32 = arith.constant 2 : i32
    %c8_i32_22 = arith.constant 8 : i32
    %64 = arith.muli %c2_i32, %c8_i32_22 : i32
    %65 = tpu.assume_multiple %64, 8 : i32
    %66 = arith.index_cast %65 : i32 to index
    %c0_23 = arith.constant 0 : index
    %67 = vector.load %arg10[%66, %c0_23] : memref<64x128xf32, #tpu.memory_space<vmem>>, vector<8x128xf32>
    %cst_24 = arith.constant dense<0.000000e+00> : vector<8x128xf32>
    %68 = tpu.matmul %63, %8, %cst_24 {dimension_numbers = #tpu.dot_dimension_numbers<[1], [0], [0], [1], [0, 0, 1, 1], [], []>} : vector<8x32xf32>, vector<32x128xf32>, vector<8x128xf32> -> vector<8x128xf32>
    %69 = arith.addf %67, %68 : vector<8x128xf32>
    %cst_25 = arith.constant 5.000000e-01 : f32
    %70 = vector.broadcast %cst_25 : f32 to vector<8x128xf32>
    %71 = arith.mulf %70, %69 : vector<8x128xf32>
    %72 = arith.select %14, %69, %71 : vector<8x128xi1>, vector<8x128xf32>
    %73 = math.tanh %72 : vector<8x128xf32>
    %cst_26 = arith.constant 5.000000e-01 : f32
    %74 = vector.broadcast %cst_26 : f32 to vector<8x128xf32>
    %75 = arith.mulf %74, %73 : vector<8x128xf32>
    %cst_27 = arith.constant 5.000000e-01 : f32
    %76 = vector.broadcast %cst_27 : f32 to vector<8x128xf32>
    %77 = arith.addf %75, %76 : vector<8x128xf32>
    %78 = arith.select %14, %73, %77 : vector<8x128xi1>, vector<8x128xf32>
    %79 = vector.extract_strided_slice %78 {offsets = [0, 0], sizes = [8, 32], strides = [1, 1]} : vector<8x128xf32> to vector<8x32xf32>
    %80 = vector.extract_strided_slice %78 {offsets = [0, 32], sizes = [8, 32], strides = [1, 1]} : vector<8x128xf32> to vector<8x32xf32>
    %81 = vector.extract_strided_slice %78 {offsets = [0, 64], sizes = [8, 32], strides = [1, 1]} : vector<8x128xf32> to vector<8x32xf32>
    %82 = vector.extract_strided_slice %78 {offsets = [0, 96], sizes = [8, 32], strides = [1, 1]} : vector<8x128xf32> to vector<8x32xf32>
    %83 = arith.mulf %80, %61 : vector<8x32xf32>
    %84 = arith.mulf %79, %81 : vector<8x32xf32>
    %85 = arith.addf %83, %84 : vector<8x32xf32>
    %86 = math.tanh %85 : vector<8x32xf32>
    %87 = arith.mulf %82, %86 : vector<8x32xf32>
    %c3_i32 = arith.constant 3 : i32
    %c8_i32_28 = arith.constant 8 : i32
    %88 = arith.muli %c3_i32, %c8_i32_28 : i32
    %89 = tpu.assume_multiple %88, 8 : i32
    %90 = arith.index_cast %89 : i32 to index
    %c0_29 = arith.constant 0 : index
    %91 = vector.load %arg10[%90, %c0_29] : memref<64x128xf32, #tpu.memory_space<vmem>>, vector<8x128xf32>
    %cst_30 = arith.constant dense<0.000000e+00> : vector<8x128xf32>
    %92 = tpu.matmul %87, %8, %cst_30 {dimension_numbers = #tpu.dot_dimension_numbers<[1], [0], [0], [1], [0, 0, 1, 1], [], []>} : vector<8x32xf32>, vector<32x128xf32>, vector<8x128xf32> -> vector<8x128xf32>
    %93 = arith.addf %91, %92 : vector<8x128xf32>
    %cst_31 = arith.constant 5.000000e-01 : f32
    %94 = vector.broadcast %cst_31 : f32 to vector<8x128xf32>
    %95 = arith.mulf %94, %93 : vector<8x128xf32>
    %96 = arith.select %14, %93, %95 : vector<8x128xi1>, vector<8x128xf32>
    %97 = math.tanh %96 : vector<8x128xf32>
    %cst_32 = arith.constant 5.000000e-01 : f32
    %98 = vector.broadcast %cst_32 : f32 to vector<8x128xf32>
    %99 = arith.mulf %98, %97 : vector<8x128xf32>
    %cst_33 = arith.constant 5.000000e-01 : f32
    %100 = vector.broadcast %cst_33 : f32 to vector<8x128xf32>
    %101 = arith.addf %99, %100 : vector<8x128xf32>
    %102 = arith.select %14, %97, %101 : vector<8x128xi1>, vector<8x128xf32>
    %103 = vector.extract_strided_slice %102 {offsets = [0, 0], sizes = [8, 32], strides = [1, 1]} : vector<8x128xf32> to vector<8x32xf32>
    %104 = vector.extract_strided_slice %102 {offsets = [0, 32], sizes = [8, 32], strides = [1, 1]} : vector<8x128xf32> to vector<8x32xf32>
    %105 = vector.extract_strided_slice %102 {offsets = [0, 64], sizes = [8, 32], strides = [1, 1]} : vector<8x128xf32> to vector<8x32xf32>
    %106 = vector.extract_strided_slice %102 {offsets = [0, 96], sizes = [8, 32], strides = [1, 1]} : vector<8x128xf32> to vector<8x32xf32>
    %107 = arith.mulf %104, %85 : vector<8x32xf32>
    %108 = arith.mulf %103, %105 : vector<8x32xf32>
    %109 = arith.addf %107, %108 : vector<8x32xf32>
    %110 = math.tanh %109 : vector<8x32xf32>
    %111 = arith.mulf %106, %110 : vector<8x32xf32>
    %c4_i32 = arith.constant 4 : i32
    %c8_i32_34 = arith.constant 8 : i32
    %112 = arith.muli %c4_i32, %c8_i32_34 : i32
    %113 = tpu.assume_multiple %112, 8 : i32
    %114 = arith.index_cast %113 : i32 to index
    %c0_35 = arith.constant 0 : index
    %115 = vector.load %arg10[%114, %c0_35] : memref<64x128xf32, #tpu.memory_space<vmem>>, vector<8x128xf32>
    %cst_36 = arith.constant dense<0.000000e+00> : vector<8x128xf32>
    %116 = tpu.matmul %111, %8, %cst_36 {dimension_numbers = #tpu.dot_dimension_numbers<[1], [0], [0], [1], [0, 0, 1, 1], [], []>} : vector<8x32xf32>, vector<32x128xf32>, vector<8x128xf32> -> vector<8x128xf32>
    %117 = arith.addf %115, %116 : vector<8x128xf32>
    %cst_37 = arith.constant 5.000000e-01 : f32
    %118 = vector.broadcast %cst_37 : f32 to vector<8x128xf32>
    %119 = arith.mulf %118, %117 : vector<8x128xf32>
    %120 = arith.select %14, %117, %119 : vector<8x128xi1>, vector<8x128xf32>
    %121 = math.tanh %120 : vector<8x128xf32>
    %cst_38 = arith.constant 5.000000e-01 : f32
    %122 = vector.broadcast %cst_38 : f32 to vector<8x128xf32>
    %123 = arith.mulf %122, %121 : vector<8x128xf32>
    %cst_39 = arith.constant 5.000000e-01 : f32
    %124 = vector.broadcast %cst_39 : f32 to vector<8x128xf32>
    %125 = arith.addf %123, %124 : vector<8x128xf32>
    %126 = arith.select %14, %121, %125 : vector<8x128xi1>, vector<8x128xf32>
    %127 = vector.extract_strided_slice %126 {offsets = [0, 0], sizes = [8, 32], strides = [1, 1]} : vector<8x128xf32> to vector<8x32xf32>
    %128 = vector.extract_strided_slice %126 {offsets = [0, 32], sizes = [8, 32], strides = [1, 1]} : vector<8x128xf32> to vector<8x32xf32>
    %129 = vector.extract_strided_slice %126 {offsets = [0, 64], sizes = [8, 32], strides = [1, 1]} : vector<8x128xf32> to vector<8x32xf32>
    %130 = vector.extract_strided_slice %126 {offsets = [0, 96], sizes = [8, 32], strides = [1, 1]} : vector<8x128xf32> to vector<8x32xf32>
    %131 = arith.mulf %128, %109 : vector<8x32xf32>
    %132 = arith.mulf %127, %129 : vector<8x32xf32>
    %133 = arith.addf %131, %132 : vector<8x32xf32>
    %134 = math.tanh %133 : vector<8x32xf32>
    %135 = arith.mulf %130, %134 : vector<8x32xf32>
    %c5_i32 = arith.constant 5 : i32
    %c8_i32_40 = arith.constant 8 : i32
    %136 = arith.muli %c5_i32, %c8_i32_40 : i32
    %137 = tpu.assume_multiple %136, 8 : i32
    %138 = arith.index_cast %137 : i32 to index
    %c0_41 = arith.constant 0 : index
    %139 = vector.load %arg10[%138, %c0_41] : memref<64x128xf32, #tpu.memory_space<vmem>>, vector<8x128xf32>
    %cst_42 = arith.constant dense<0.000000e+00> : vector<8x128xf32>
    %140 = tpu.matmul %135, %8, %cst_42 {dimension_numbers = #tpu.dot_dimension_numbers<[1], [0], [0], [1], [0, 0, 1, 1], [], []>} : vector<8x32xf32>, vector<32x128xf32>, vector<8x128xf32> -> vector<8x128xf32>
    %141 = arith.addf %139, %140 : vector<8x128xf32>
    %cst_43 = arith.constant 5.000000e-01 : f32
    %142 = vector.broadcast %cst_43 : f32 to vector<8x128xf32>
    %143 = arith.mulf %142, %141 : vector<8x128xf32>
    %144 = arith.select %14, %141, %143 : vector<8x128xi1>, vector<8x128xf32>
    %145 = math.tanh %144 : vector<8x128xf32>
    %cst_44 = arith.constant 5.000000e-01 : f32
    %146 = vector.broadcast %cst_44 : f32 to vector<8x128xf32>
    %147 = arith.mulf %146, %145 : vector<8x128xf32>
    %cst_45 = arith.constant 5.000000e-01 : f32
    %148 = vector.broadcast %cst_45 : f32 to vector<8x128xf32>
    %149 = arith.addf %147, %148 : vector<8x128xf32>
    %150 = arith.select %14, %145, %149 : vector<8x128xi1>, vector<8x128xf32>
    %151 = vector.extract_strided_slice %150 {offsets = [0, 0], sizes = [8, 32], strides = [1, 1]} : vector<8x128xf32> to vector<8x32xf32>
    %152 = vector.extract_strided_slice %150 {offsets = [0, 32], sizes = [8, 32], strides = [1, 1]} : vector<8x128xf32> to vector<8x32xf32>
    %153 = vector.extract_strided_slice %150 {offsets = [0, 64], sizes = [8, 32], strides = [1, 1]} : vector<8x128xf32> to vector<8x32xf32>
    %154 = vector.extract_strided_slice %150 {offsets = [0, 96], sizes = [8, 32], strides = [1, 1]} : vector<8x128xf32> to vector<8x32xf32>
    %155 = arith.mulf %152, %133 : vector<8x32xf32>
    %156 = arith.mulf %151, %153 : vector<8x32xf32>
    %157 = arith.addf %155, %156 : vector<8x32xf32>
    %158 = math.tanh %157 : vector<8x32xf32>
    %159 = arith.mulf %154, %158 : vector<8x32xf32>
    %c6_i32 = arith.constant 6 : i32
    %c8_i32_46 = arith.constant 8 : i32
    %160 = arith.muli %c6_i32, %c8_i32_46 : i32
    %161 = tpu.assume_multiple %160, 8 : i32
    %162 = arith.index_cast %161 : i32 to index
    %c0_47 = arith.constant 0 : index
    %163 = vector.load %arg10[%162, %c0_47] : memref<64x128xf32, #tpu.memory_space<vmem>>, vector<8x128xf32>
    %cst_48 = arith.constant dense<0.000000e+00> : vector<8x128xf32>
    %164 = tpu.matmul %159, %8, %cst_48 {dimension_numbers = #tpu.dot_dimension_numbers<[1], [0], [0], [1], [0, 0, 1, 1], [], []>} : vector<8x32xf32>, vector<32x128xf32>, vector<8x128xf32> -> vector<8x128xf32>
    %165 = arith.addf %163, %164 : vector<8x128xf32>
    %cst_49 = arith.constant 5.000000e-01 : f32
    %166 = vector.broadcast %cst_49 : f32 to vector<8x128xf32>
    %167 = arith.mulf %166, %165 : vector<8x128xf32>
    %168 = arith.select %14, %165, %167 : vector<8x128xi1>, vector<8x128xf32>
    %169 = math.tanh %168 : vector<8x128xf32>
    %cst_50 = arith.constant 5.000000e-01 : f32
    %170 = vector.broadcast %cst_50 : f32 to vector<8x128xf32>
    %171 = arith.mulf %170, %169 : vector<8x128xf32>
    %cst_51 = arith.constant 5.000000e-01 : f32
    %172 = vector.broadcast %cst_51 : f32 to vector<8x128xf32>
    %173 = arith.addf %171, %172 : vector<8x128xf32>
    %174 = arith.select %14, %169, %173 : vector<8x128xi1>, vector<8x128xf32>
    %175 = vector.extract_strided_slice %174 {offsets = [0, 0], sizes = [8, 32], strides = [1, 1]} : vector<8x128xf32> to vector<8x32xf32>
    %176 = vector.extract_strided_slice %174 {offsets = [0, 32], sizes = [8, 32], strides = [1, 1]} : vector<8x128xf32> to vector<8x32xf32>
    %177 = vector.extract_strided_slice %174 {offsets = [0, 64], sizes = [8, 32], strides = [1, 1]} : vector<8x128xf32> to vector<8x32xf32>
    %178 = vector.extract_strided_slice %174 {offsets = [0, 96], sizes = [8, 32], strides = [1, 1]} : vector<8x128xf32> to vector<8x32xf32>
    %179 = arith.mulf %176, %157 : vector<8x32xf32>
    %180 = arith.mulf %175, %177 : vector<8x32xf32>
    %181 = arith.addf %179, %180 : vector<8x32xf32>
    %182 = math.tanh %181 : vector<8x32xf32>
    %183 = arith.mulf %178, %182 : vector<8x32xf32>
    %c7_i32 = arith.constant 7 : i32
    %c8_i32_52 = arith.constant 8 : i32
    %184 = arith.muli %c7_i32, %c8_i32_52 : i32
    %185 = tpu.assume_multiple %184, 8 : i32
    %186 = arith.index_cast %185 : i32 to index
    %c0_53 = arith.constant 0 : index
    %187 = vector.load %arg10[%186, %c0_53] : memref<64x128xf32, #tpu.memory_space<vmem>>, vector<8x128xf32>
    %cst_54 = arith.constant dense<0.000000e+00> : vector<8x128xf32>
    %188 = tpu.matmul %183, %8, %cst_54 {dimension_numbers = #tpu.dot_dimension_numbers<[1], [0], [0], [1], [0, 0, 1, 1], [], []>} : vector<8x32xf32>, vector<32x128xf32>, vector<8x128xf32> -> vector<8x128xf32>
    %189 = arith.addf %187, %188 : vector<8x128xf32>
    %cst_55 = arith.constant 5.000000e-01 : f32
    %190 = vector.broadcast %cst_55 : f32 to vector<8x128xf32>
    %191 = arith.mulf %190, %189 : vector<8x128xf32>
    %192 = arith.select %14, %189, %191 : vector<8x128xi1>, vector<8x128xf32>
    %193 = math.tanh %192 : vector<8x128xf32>
    %cst_56 = arith.constant 5.000000e-01 : f32
    %194 = vector.broadcast %cst_56 : f32 to vector<8x128xf32>
    %195 = arith.mulf %194, %193 : vector<8x128xf32>
    %cst_57 = arith.constant 5.000000e-01 : f32
    %196 = vector.broadcast %cst_57 : f32 to vector<8x128xf32>
    %197 = arith.addf %195, %196 : vector<8x128xf32>
    %198 = arith.select %14, %193, %197 : vector<8x128xi1>, vector<8x128xf32>
    %199 = vector.extract_strided_slice %198 {offsets = [0, 0], sizes = [8, 32], strides = [1, 1]} : vector<8x128xf32> to vector<8x32xf32>
    %200 = vector.extract_strided_slice %198 {offsets = [0, 32], sizes = [8, 32], strides = [1, 1]} : vector<8x128xf32> to vector<8x32xf32>
    %201 = vector.extract_strided_slice %198 {offsets = [0, 64], sizes = [8, 32], strides = [1, 1]} : vector<8x128xf32> to vector<8x32xf32>
    %202 = vector.extract_strided_slice %198 {offsets = [0, 96], sizes = [8, 32], strides = [1, 1]} : vector<8x128xf32> to vector<8x32xf32>
    %203 = arith.mulf %200, %181 : vector<8x32xf32>
    %204 = arith.mulf %199, %201 : vector<8x32xf32>
    %205 = arith.addf %203, %204 : vector<8x32xf32>
    %206 = math.tanh %205 : vector<8x32xf32>
    %207 = arith.mulf %202, %206 : vector<8x32xf32>
    %c8_i32_58 = arith.constant 8 : i32
    %c0_59 = arith.constant 0 : index
    %c0_60 = arith.constant 0 : index
    %208 = vector.load %arg5[%c0_59, %c0_60] : memref<32x40xf32, #tpu.memory_space<vmem>>, vector<32x40xf32>
    %cst_61 = arith.constant dense<0.000000e+00> : vector<8x40xf32>
    %209 = tpu.matmul %207, %208, %cst_61 {dimension_numbers = #tpu.dot_dimension_numbers<[1], [0], [0], [1], [0, 0, 1, 1], [], []>} : vector<8x32xf32>, vector<32x40xf32>, vector<8x40xf32> -> vector<8x40xf32>
    %c0_62 = arith.constant 0 : index
    %c0_63 = arith.constant 0 : index
    %210 = vector.load %arg6[%c0_62, %c0_63] : memref<1x40xf32, #tpu.memory_space<vmem>>, vector<1x40xf32>
    %211 = vector.broadcast %210 : vector<1x40xf32> to vector<8x40xf32>
    %212 = arith.addf %209, %211 : vector<8x40xf32>
    %c0_64 = arith.constant 0 : index
    %c0_65 = arith.constant 0 : index
    %213 = vector.load %arg7[%c0_64, %c0_65] : memref<40x1xf32, #tpu.memory_space<vmem>>, vector<40x1xf32>
    %cst_66 = arith.constant dense<0.000000e+00> : vector<8x1xf32>
    %214 = tpu.matmul %212, %213, %cst_66 {dimension_numbers = #tpu.dot_dimension_numbers<[1], [0], [0], [1], [0, 0, 1, 1], [], []>} : vector<8x40xf32>, vector<40x1xf32>, vector<8x1xf32> -> vector<8x1xf32>
    %c0_67 = arith.constant 0 : index
    %c0_68 = arith.constant 0 : index
    %215 = vector.load %arg8[%c0_67, %c0_68] : memref<1x1xf32, #tpu.memory_space<vmem>>, vector<1x1xf32>
    %216 = vector.broadcast %215 : vector<1x1xf32> to vector<8x1xf32>
    %217 = arith.addf %214, %216 : vector<8x1xf32>
    %218 = arith.negf %217 : vector<8x1xf32>
    %219 = math.exp %218 : vector<8x1xf32>
    %cst_69 = arith.constant 1.000000e+00 : f32
    %220 = vector.broadcast %cst_69 : f32 to vector<8x1xf32>
    %221 = arith.addf %220, %219 : vector<8x1xf32>
    %222 = arith.divf %220, %221 : vector<8x1xf32>
    %cst_70 = arith.constant 9.000000e+00 : f32
    %223 = vector.broadcast %cst_70 : f32 to vector<8x1xf32>
    %224 = arith.mulf %222, %223 : vector<8x1xf32>
    %cst_71 = arith.constant 1.000000e+00 : f32
    %225 = vector.broadcast %cst_71 : f32 to vector<8x1xf32>
    %226 = arith.addf %224, %225 : vector<8x1xf32>
    %c0_72 = arith.constant 0 : index
    %c0_73 = arith.constant 0 : index
    %227 = vector.load %arg9[%c0_72, %c0_73] : memref<8x1xf32, #tpu.memory_space<vmem>>, vector<8x1xf32>
    tpu.vector_store %arg9[%c0_72, %c0_73], %226 {strides = array<i32>} : memref<8x1xf32, #tpu.memory_space<vmem>>, vector<8x1xf32>,
    return
  }
  func.func @transform_0(%arg0: i32) -> (i32, i32, i32) {
    %c0_i32 = arith.constant 0 : i32
    %c0_i32_0 = arith.constant 0 : i32
    %c0_i32_1 = arith.constant 0 : i32
    return %c0_i32, %arg0, %c0_i32_0 : i32, i32, i32
  }
  func.func @transform_1(%arg0: i32) -> (i32, i32) {
    %c0_i32 = arith.constant 0 : i32
    %c0_i32_0 = arith.constant 0 : i32
    %c0_i32_1 = arith.constant 0 : i32
    return %c0_i32, %c0_i32_0 : i32, i32
  }
  func.func @transform_2(%arg0: i32) -> (i32, i32) {
    %c0_i32 = arith.constant 0 : i32
    %c0_i32_0 = arith.constant 0 : i32
    %c0_i32_1 = arith.constant 0 : i32
    return %c0_i32, %c0_i32_0 : i32, i32
  }
  func.func @transform_3(%arg0: i32) -> (i32, i32) {
    %c0_i32 = arith.constant 0 : i32
    %c0_i32_0 = arith.constant 0 : i32
    %c0_i32_1 = arith.constant 0 : i32
    return %c0_i32, %c0_i32_0 : i32, i32
  }
  func.func @transform_4(%arg0: i32) -> (i32, i32) {
    %c0_i32 = arith.constant 0 : i32
    %c0_i32_0 = arith.constant 0 : i32
    %c0_i32_1 = arith.constant 0 : i32
    return %c0_i32, %c0_i32_0 : i32, i32
  }
  func.func @transform_5(%arg0: i32) -> (i32, i32) {
    %c0_i32 = arith.constant 0 : i32
    %c0_i32_0 = arith.constant 0 : i32
    %c0_i32_1 = arith.constant 0 : i32
    return %c0_i32, %c0_i32_0 : i32, i32
  }
  func.func @transform_6(%arg0: i32) -> (i32, i32) {
    %c0_i32 = arith.constant 0 : i32
    %c0_i32_0 = arith.constant 0 : i32
    %c0_i32_1 = arith.constant 0 : i32
    return %c0_i32, %c0_i32_0 : i32, i32
  }
  func.func @transform_7(%arg0: i32) -> (i32, i32) {
    %c0_i32 = arith.constant 0 : i32
    %c0_i32_0 = arith.constant 0 : i32
    %c0_i32_1 = arith.constant 0 : i32
    return %c0_i32, %c0_i32_0 : i32, i32
  }
  func.func @transform_8(%arg0: i32) -> (i32, i32) {
    %c0_i32 = arith.constant 0 : i32
    %c0_i32_0 = arith.constant 0 : i32
    return %arg0, %c0_i32 : i32, i32
  }
}

</mosaic_0001>

<bundles_post_ra>
// kernel: lstm_classifier_forward.1
= control target key start
LH: loop header
LB: loop body
LE: loop exit
PB: predicated region body
PF: predicated region fallthrough
CT: control target
= control target key end

     0   :  { %v1513_v2 = vmov 0.0|0.0   ;;  %vm50_vm0 = vcmask 261120   ;;  %vm1514_vm1 = vmmov 0   ;;  %v1515_v4 = vmov 0.0   ;;  %s1517_s25 = smov 32   ;;  %s1818_s1 = inlined_call_operand.vmem [shape: f32[32,128], index: 1, kind: input, shape index: {}]   ;;  %s1819_s3 = inlined_call_operand.vmem [shape: f32[32,128], index: 3, kind: input, shape index: {}]   ;;  %s1820_s0 = inlined_call_operand.vmem [shape: f32[8,8,32], index: 0, kind: input, shape index: {}]   ;;  %s1821_s2 = inlined_call_operand.vmem [shape: f32[1,128], index: 2, kind: input, shape index: {}]   ;;  %s1822_s4 = inlined_call_operand.vmem [shape: f32[32,40], index: 4, kind: input, shape index: {}]   ;;  %s1823_s6 = inlined_call_operand.vmem [shape: f32[40,1], index: 6, kind: input, shape index: {}]   ;;  %s1824_s7 = inlined_call_operand.<no memory space> [shape: f32[1,1], index: 7, kind: input, shape index: {}]   ;;  %s1825_s5 = inlined_call_operand.vmem [shape: f32[1,40], index: 5, kind: input, shape index: {}]   ;;  %s1826_s8 = inlined_call_operand.vmem [shape: f32[8,1], index: 8, kind: output, shape index: {}]  }
   0x1   :  { %v39_v0 = vld [vmem:[%s1818_s1] sm:$0xff]  ;;  %v40_v1 = vld [vmem:[%s1818_s1 + $0x8] sm:$0xff]  ;;  %1412 = vmatprep.subr.bf16.mxu1 %v1513_v2  ;;  %1300 = vmatprep.mubr.msk.f32.mxu1 %vm1514_vm1, %v1515_v4  ;;  %v41_v7 = vld [vmem:[%s1818_s1 + $0x10] sm:$0xff]  ;;  %v192_v16 = vlaneseq  ;;  %vm1100_vm5 = vcmask 326656   ;;  %vm1182_vm6 = vcmask 7168  }
   0x2   :  { %v188_v3 = vld [vmem:[%s1819_s3] sm:$0xff]  ;;  %v1404_v5 = vpack.c.bf16 %v40_v1, %v39_v0  ;;  %v189_v6 = vld [vmem:[%s1819_s3 + $0x8] sm:$0xff]  ;;  %v42_v8 = vld [vmem:[%s1818_s1 + $0x18] sm:$0xff] }
   0x3   :  { %v1584_v9 = vpack.c.bf16 %v189_v6, %v188_v3  ;;  %v1408_v10 = vpack.c.bf16 %v42_v8, %v41_v7  ;;  %v31_v11 = vld [vmem:[%s1820_s0] sm:$0xff]  ;;  %v190_v12 = vld [vmem:[%s1819_s3 + $0x10] sm:$0xff]  ;;  %v191_v13 = vld [vmem:[%s1819_s3 + $0x18] sm:$0xff]  ;;  %v193_v17 = vand.u32 127, %v192_v16 }
   0x4   :  { %1405 = vmatprep.subr.bf16.mxu0 %v1404_v5  ;;  %1280 = vmatprep.mubr.msk.f32.mxu0 %vm50_vm0, %v31_v11  ;;  %v1597_v14 = vpack.c.bf16 %v191_v13, %v190_v12  ;;  %v32_v15 = vld [vmem:[%s1820_s0 + $0x8] sm:$0xff]  ;;  %v1621_v18 = vld [vmem:[%s1821_s2] ss:$0 sm:$0xff]  ;;  %s1516_s2 = smov 64   ;;  %v33_v56 = vld [vmem:[%s1820_s0 + $0x10] sm:$0xff] }
   0x5   :  { %1407 = vmatpush3.bf16.msra.mxu0 %v1404_v5  ;;  %1414 = vmatpush3.bf16.msra.mxu1 %v1584_v9  ;;  %vm194_vm2 = vcmp.ge.s32.totalorder %v193_v17, 64  ;;  %vm195_vm3 = vcmp.lt.s32.totalorder %v193_v17, 96  ;;  %v34_v57 = vld [vmem:[%s1820_s0 + $0x18] sm:$0xff]  ;;  %v35_v58 = vld [vmem:[%s1820_s0 + $0x20] sm:$0xff]  ;;  %v36_v59 = vld [vmem:[%s1820_s0 + $0x28] sm:$0xff] }
   0x6   :  { %1409 = vmatprep.subr.bf16.mxu0 %v1408_v10  ;;  %1415 = vmatprep.subr.bf16.mxu1 %v1513_v2  ;;  %vm1624_vm4 = vmand %vm194_vm2, %vm195_vm3  ;;  %v37_v60 = vld [vmem:[%s1820_s0 + $0x30] sm:$0xff]  ;;  %v38_v61 = vld [vmem:[%s1820_s0 + $0x38] sm:$0xff] }
   0x7   :  { %v1004_v25 = vld [vmem:[%s1822_s4 + $0x10] sm:$0xff] }
   0x9   :  { %1411 = vmatpush3.bf16.msra.mxu0 %v1408_v10  ;;  %1417 = vmatpush3.bf16.msra.mxu1 %v1597_v14 }
   0xa   :  { %1418 = vmatprep.subr.bf16.mxu1 %v1513_v2  ;;  %1424 = vmatprep.subr.bf16.mxu0 %v1513_v2 }
   0xc   :  { %1281 = vmatmul.mubr.msk.f32.vlgmr.msra.gmra.mrb[0].mxu0 %vm50_vm0, %v32_v15  ;;  %1301 = vmatmul.mubr.f32.vlgmr.msra.gmra.mrb[0].mxu1 %v1515_v4 }
   0xd   :  { %1420 = vmatpush3.bf16.msra.mxu1 %v1584_v9  ;;  %1311 = vmatprep.mubr.msk.f32.mxu1 %vm1514_vm1, %v1515_v4 }
   0xe   :  { %1421 = vmatprep.subr.bf16.mxu1 %v1513_v2  ;;  %1426 = vmatpush3.bf16.msra.mxu0 %v1584_v9 }
   0xf   :  { %1427 = vmatprep.subr.bf16.mxu0 %v1513_v2  ;;  %1283 = vmatprep.mubr.msk.f32.mxu0 %vm50_vm0, %v33_v56 }
  0x10   :  { %1284 = vmatmul.mubr.msk.f32.gmra.mrb[2].mxu0 %vm50_vm0, %v34_v57 }
  0x11   :  { %1423 = vmatpush3.bf16.msra.mxu1 %v1597_v14  ;;  %1286 = vmatprep.mubr.msk.f32.mxu0 %vm50_vm0, %v35_v58 }
  0x12   :  { %1429 = vmatpush3.bf16.msra.mxu0 %v1597_v14  ;;  %1430 = vmatprep.subr.bf16.mxu1 %v1513_v2 }
  0x13   :  { %1436 = vmatprep.subr.bf16.mxu0 %v1513_v2 }
  0x14   :  { %1287 = vmatmul.mubr.msk.f32.gmra.mrb[4].mxu0 %vm50_vm0, %v36_v59 }
  0x15   :  { %1289 = vmatprep.mubr.msk.f32.mxu0 %vm50_vm0, %v37_v60 }
  0x18   :  { %1290 = vmatmul.mubr.msk.f32.gmra.mrb[6].mxu0 %vm50_vm0, %v38_v61 }
  0x19   :  { %1322 = vmatprep.mubr.msk.f32.mxu0 %vm1514_vm1, %v1515_v4 }
  0xdf   :  { %v1282_v19 = vpop.f32.mrb[0].mxu0  ;;  %v267_v20 = vpop.f32.mrb[0].mxu1 }
  0xe0   :  { %v141_v21 = vpop.f32.mrb[1].mxu0  ;;  %v1302_v22 = vpop.f32.mrb[1].mxu1  ;;  %v147_v41 = vadd.f32 %v1282_v19, %v1621_v18 }
  0xe1   :  { %v142_v23 = vadd.f32 %v1621_v18, %v141_v21 }
  0xe3   :  { %v271_v24 = vadd.f32 %v267_v20, %v142_v23  ;;  %v1285_v1 = vpop.f32.mrb[2].mxu0 }
  0xe4   :  { %v151_v3 = vpop.f32.mrb[3].mxu0 }
  0xe5   :  { %v272_v26 = vmul.f32 0.5, %v271_v24  ;;  %v152_v11 = vadd.f32 %v1621_v18, %v151_v3 }
  0xe7   :  { %v273_v27 = vsel %vm1624_vm4, %v271_v24, %v272_v26  ;;  %v1678_v5 = vpop.f32.mrb[4].mxu0 }
  0xe8   :  { %1477 = vtanh.f32 %v273_v27  ;;  %v1680_v6 = vpop.f32.mrb[5].mxu0 }
  0xeb   :  { %v1682_v7 = vpop.f32.mrb[6].mxu0 }
  0xec   :  { %v1684_v8 = vpop.f32.mrb[7].mxu0 }
  0xf2   :  { %v1478_v28 = vpop.eup %1477 }
  0xf3   :  { %v275_v29 = vmul.f32 0.5, %v1478_v28 }
  0xf5   :  { %v276_v30 = vadd.f32 0.5, %v275_v29 }
  0xf7   :  { %v277_v31 = vsel %vm1624_vm4, %v1478_v28, %v276_v30 }
  0xf8   :  { %280 = vrot.lane.b32.xlu0 %v277_v31, %s1516_s2  ;;  %v278_v34 = vmul.f32 0.0, %v277_v31 }
 0x16a   :  { %v281_v32 = vpop.permute.xlu0 %280 }
 0x16b   :  { %v283_v33 = vmul.f32 %v281_v32, %v277_v31 }
 0x16d   :  { %285 = vrot.lane.b32.xlu0 %v283_v33, %s1517_s25  ;;  %v157_v33 = vadd.f32 %v1285_v1, %v1621_v18 }
 0x1df   :  { %v286_v35 = vpop.permute.xlu0 %285 }
 0x1e0   :  { %v288_v36 = vadd.f32 %v286_v35, %v278_v34 }
 0x1e2   :  { %1479 = vtanh.f32 %v288_v36 }
 0x1ec   :  { %v1480_v37 = vpop.eup %1479 }
 0x1ed   :  { %291 = vrot.lane.b32.xlu1 %v1480_v37, %s1516_s2 }
 0x25f   :  { %v292_v38 = vpop.permute.xlu1 %291 }
 0x260   :  { %v294_v39 = vmul.f32 %v292_v38, %v277_v31 }
 0x262   :  { %298 = vrot.lane.b32.xlu1 %v294_v39, %s1517_s25 }
 0x2d4   :  { %v299_v40 = vpop.permute.xlu1 %298 }
 0x2d5   :  { %1312 = vmatmul.mubr.msk.f32.vlgmr.msra.gmra.mrb[2].mxu1 %vm50_vm0, %v299_v40 }
 0x2d6   :  { %1432 = vmatpush3.bf16.msra.mxu1 %v1584_v9  ;;  %1333 = vmatprep.mubr.msk.f32.mxu1 %vm1514_vm1, %v1515_v4 }
 0x2d7   :  { %1433 = vmatprep.subr.bf16.mxu1 %v1513_v2 }
 0x2da   :  { %1435 = vmatpush3.bf16.msra.mxu1 %v1597_v14 }
 0x2db   :  { %1442 = vmatprep.subr.bf16.mxu1 %v1513_v2 }
 0x3a8   :  { %v368_v42 = vpop.f32.mrb[2].mxu1 }
 0x3a9   :  { %v372_v43 = vadd.f32 %v368_v42, %v147_v41  ;;  %v1313_v44 = vpop.f32.mrb[3].mxu1 }
 0x3ab   :  { %v373_v45 = vmul.f32 0.5, %v372_v43 }
 0x3ad   :  { %v374_v46 = vsel %vm1624_vm4, %v372_v43, %v373_v45 }
 0x3ae   :  { %1481 = vtanh.f32 %v374_v46 }
 0x3b8   :  { %v1482_v47 = vpop.eup %1481 }
 0x3b9   :  { %v376_v48 = vmul.f32 0.5, %v1482_v47 }
 0x3bb   :  { %v377_v49 = vadd.f32 0.5, %v376_v48 }
 0x3bd   :  { %v378_v50 = vsel %vm1624_vm4, %v1482_v47, %v377_v49 }
 0x3be   :  { %381 = vrot.lane.b32.xlu0 %v378_v50, %s1516_s2  ;;  %v379_v53 = vmul.f32 %v378_v50, %v288_v36 }
 0x430   :  { %v382_v51 = vpop.permute.xlu0 %381 }
 0x431   :  { %v384_v52 = vmul.f32 %v382_v51, %v378_v50 }
 0x433   :  { %386 = vrot.lane.b32.xlu1 %v384_v52, %s1517_s25  ;;  %v162_v52 = vadd.f32 %v1621_v18, %v1680_v6 }
 0x4a5   :  { %v387_v54 = vpop.permute.xlu1 %386 }
 0x4a6   :  { %v389_v55 = vadd.f32 %v387_v54, %v379_v53 }
 0x4a8   :  { %1483 = vtanh.f32 %v389_v55 }
 0x4b2   :  { %v1484_v62 = vpop.eup %1483 }
 0x4b3   :  { %392 = vrot.lane.b32.xlu0 %v1484_v62, %s1516_s2 }
 0x525   :  { %v393_v63 = vpop.permute.xlu0 %392 }
 0x526   :  { %v395_v0 = vmul.f32 %v393_v63, %v378_v50 }
 0x528   :  { %399 = vrot.lane.b32.xlu1 %v395_v0, %s1517_s25 }
 0x59a   :  { %v400_v10 = vpop.permute.xlu1 %399 }
 0x59b   :  { %1323 = vmatmul.mubr.msk.f32.vlgmr.msra.gmra.mrb[8].mxu0 %vm50_vm0, %v400_v10 }
 0x59c   :  { %1438 = vmatpush3.bf16.msra.mxu0 %v1584_v9  ;;  %1344 = vmatprep.mubr.msk.f32.mxu0 %vm1514_vm1, %v1515_v4 }
 0x59d   :  { %1439 = vmatprep.subr.bf16.mxu0 %v1513_v2 }
 0x5a0   :  { %1441 = vmatpush3.bf16.msra.mxu0 %v1597_v14 }
 0x5a1   :  { %1448 = vmatprep.subr.bf16.mxu0 %v1513_v2 }
 0x66e   :  { %v469_v12 = vpop.f32.mrb[8].mxu0 }
 0x66f   :  { %v473_v13 = vadd.f32 %v469_v12, %v152_v11  ;;  %v1324_v15 = vpop.f32.mrb[9].mxu0 }
 0x671   :  { %v474_v16 = vmul.f32 0.5, %v473_v13 }
 0x673   :  { %v475_v17 = vsel %vm1624_vm4, %v473_v13, %v474_v16  ;;  %v167_v13 = vadd.f32 %v1678_v5, %v1621_v18 }
 0x674   :  { %1485 = vtanh.f32 %v475_v17 }
 0x67e   :  { %v1486_v19 = vpop.eup %1485 }
 0x67f   :  { %v477_v20 = vmul.f32 0.5, %v1486_v19 }
 0x681   :  { %v478_v21 = vadd.f32 0.5, %v477_v20 }
 0x683   :  { %v479_v22 = vsel %vm1624_vm4, %v1486_v19, %v478_v21 }
 0x684   :  { %482 = vrot.lane.b32.xlu0 %v479_v22, %s1516_s2  ;;  %v480_v26 = vmul.f32 %v479_v22, %v389_v55 }
 0x6f6   :  { %v483_v23 = vpop.permute.xlu0 %482 }
 0x6f7   :  { %v485_v24 = vmul.f32 %v483_v23, %v479_v22 }
 0x6f9   :  { %487 = vrot.lane.b32.xlu1 %v485_v24, %s1517_s25 }
 0x76b   :  { %v488_v27 = vpop.permute.xlu1 %487 }
 0x76c   :  { %v490_v28 = vadd.f32 %v488_v27, %v480_v26 }
 0x76e   :  { %1487 = vtanh.f32 %v490_v28 }
 0x778   :  { %v1488_v29 = vpop.eup %1487 }
 0x779   :  { %493 = vrot.lane.b32.xlu0 %v1488_v29, %s1516_s2 }
 0x7eb   :  { %v494_v30 = vpop.permute.xlu0 %493 }
 0x7ec   :  { %v496_v31 = vmul.f32 %v494_v30, %v479_v22 }
 0x7ee   :  { %500 = vrot.lane.b32.xlu1 %v496_v31, %s1517_s25 }
 0x860   :  { %v501_v32 = vpop.permute.xlu1 %500 }
 0x861   :  { %1334 = vmatmul.mubr.msk.f32.vlgmr.msra.gmra.mrb[4].mxu1 %vm50_vm0, %v501_v32  ;;  %v172_v32 = vadd.f32 %v1621_v18, %v1684_v8 }
 0x862   :  { %1444 = vmatpush3.bf16.msra.mxu1 %v1584_v9  ;;  %1355 = vmatprep.mubr.msk.f32.mxu1 %vm1514_vm1, %v1515_v4 }
 0x863   :  { %1445 = vmatprep.subr.bf16.mxu1 %v1513_v2 }
 0x866   :  { %1447 = vmatpush3.bf16.msra.mxu1 %v1597_v14 }
 0x867   :  { %1454 = vmatprep.subr.bf16.mxu1 %v1513_v2 }
 0x934   :  { %v570_v34 = vpop.f32.mrb[4].mxu1 }
 0x935   :  { %v574_v35 = vadd.f32 %v570_v34, %v157_v33  ;;  %v1335_v36 = vpop.f32.mrb[5].mxu1 }
 0x937   :  { %v575_v37 = vmul.f32 0.5, %v574_v35 }
 0x939   :  { %v576_v38 = vsel %vm1624_vm4, %v574_v35, %v575_v37 }
 0x93a   :  { %1489 = vtanh.f32 %v576_v38 }
 0x944   :  { %v1490_v39 = vpop.eup %1489 }
 0x945   :  { %v578_v40 = vmul.f32 0.5, %v1490_v39 }
 0x947   :  { %v579_v41 = vadd.f32 0.5, %v578_v40 }
 0x949   :  { %v580_v42 = vsel %vm1624_vm4, %v1490_v39, %v579_v41 }
 0x94a   :  { %583 = vrot.lane.b32.xlu0 %v580_v42, %s1516_s2  ;;  %v581_v45 = vmul.f32 %v580_v42, %v490_v28 }
 0x9bc   :  { %v584_v43 = vpop.permute.xlu0 %583 }
 0x9bd   :  { %v586_v44 = vmul.f32 %v584_v43, %v580_v42 }
 0x9bf   :  { %588 = vrot.lane.b32.xlu1 %v586_v44, %s1517_s25 }
 0xa31   :  { %v589_v46 = vpop.permute.xlu1 %588 }
 0xa32   :  { %v591_v47 = vadd.f32 %v589_v46, %v581_v45 }
 0xa34   :  { %1491 = vtanh.f32 %v591_v47 }
 0xa3e   :  { %v1492_v48 = vpop.eup %1491 }
 0xa3f   :  { %594 = vrot.lane.b32.xlu0 %v1492_v48, %s1516_s2 }
 0xab1   :  { %v595_v49 = vpop.permute.xlu0 %594 }
 0xab2   :  { %v597_v50 = vmul.f32 %v595_v49, %v580_v42 }
 0xab4   :  { %601 = vrot.lane.b32.xlu1 %v597_v50, %s1517_s25  ;;  %v177_v50 = vadd.f32 %v1682_v7, %v1621_v18 }
 0xb26   :  { %v602_v51 = vpop.permute.xlu1 %601 }
 0xb27   :  { %1345 = vmatmul.mubr.msk.f32.vlgmr.msra.gmra.mrb[10].mxu0 %vm50_vm0, %v602_v51 }
 0xb28   :  { %1450 = vmatpush3.bf16.msra.mxu0 %v1584_v9  ;;  %1366 = vmatprep.mubr.msk.f32.mxu0 %vm1514_vm1, %v1515_v4 }
 0xb29   :  { %1451 = vmatprep.subr.bf16.mxu0 %v1513_v2 }
 0xb2c   :  { %1453 = vmatpush3.bf16.msra.mxu0 %v1597_v14 }
 0xb2d   :  { %1460 = vmatprep.subr.bf16.mxu0 %v1513_v2 }
 0xbfa   :  { %v671_v53 = vpop.f32.mrb[10].mxu0 }
 0xbfb   :  { %v675_v54 = vadd.f32 %v671_v53, %v162_v52  ;;  %v1346_v55 = vpop.f32.mrb[11].mxu0 }
 0xbfd   :  { %v676_v56 = vmul.f32 0.5, %v675_v54 }
 0xbff   :  { %v677_v57 = vsel %vm1624_vm4, %v675_v54, %v676_v56 }
 0xc00   :  { %1493 = vtanh.f32 %v677_v57 }
 0xc0a   :  { %v1494_v58 = vpop.eup %1493 }
 0xc0b   :  { %v679_v59 = vmul.f32 0.5, %v1494_v58 }
 0xc0d   :  { %v680_v60 = vadd.f32 0.5, %v679_v59 }
 0xc0f   :  { %v681_v61 = vsel %vm1624_vm4, %v1494_v58, %v680_v60 }
 0xc10   :  { %684 = vrot.lane.b32.xlu0 %v681_v61, %s1516_s2  ;;  %v682_v0 = vmul.f32 %v681_v61, %v591_v47 }
 0xc82   :  { %v685_v62 = vpop.permute.xlu0 %684 }
 0xc83   :  { %v687_v63 = vmul.f32 %v685_v62, %v681_v61 }
 0xc85   :  { %689 = vrot.lane.b32.xlu1 %v687_v63, %s1517_s25  ;;  %v1002_v63 = vld [vmem:[%s1822_s4] sm:$0xff] }
 0xcf7   :  { %v690_v1 = vpop.permute.xlu1 %689 }
 0xcf8   :  { %v692_v3 = vadd.f32 %v690_v1, %v682_v0  ;;  %v1003_v0 = vld [vmem:[%s1822_s4 + $0x8] sm:$0xff] }
 0xcf9   :  { %v1461_v1 = vpack.c.bf16 %v1003_v0, %v1002_v63 }
 0xcfa   :  { %1495 = vtanh.f32 %v692_v3 }
 0xd04   :  { %v1496_v6 = vpop.eup %1495 }
 0xd05   :  { %695 = vrot.lane.b32.xlu0 %v1496_v6, %s1516_s2 }
 0xd77   :  { %v696_v10 = vpop.permute.xlu0 %695 }
 0xd78   :  { %v698_v11 = vmul.f32 %v696_v10, %v681_v61 }
 0xd7a   :  { %702 = vrot.lane.b32.xlu1 %v698_v11, %s1517_s25  ;;  %v1088_v11 = vld [vmem:[%s1823_s6] sm:$0xff] }
 0xdec   :  { %v703_v12 = vpop.permute.xlu1 %702 }
 0xded   :  { %1356 = vmatmul.mubr.msk.f32.vlgmr.msra.gmra.mrb[6].mxu1 %vm50_vm0, %v703_v12  ;;  %v1089_v12 = vld [vmem:[%s1823_s6 + $0x8] sm:$0xff] }
 0xdee   :  { %1456 = vmatpush3.bf16.msra.mxu1 %v1584_v9  ;;  %1377 = vmatprep.mubr.msk.f32.mxu1 %vm1514_vm1, %v1515_v4 }
 0xdef   :  { %1457 = vmatprep.subr.bf16.mxu1 %v1513_v2 }
 0xdf2   :  { %1459 = vmatpush3.bf16.msra.mxu1 %v1597_v14 }
 0xdf3   :  { %1466 = vmatprep.subr.bf16.mxu1 %v1513_v2 }
 0xec0   :  { %v772_v15 = vpop.f32.mrb[6].mxu1 }
 0xec1   :  { %v776_v16 = vadd.f32 %v772_v15, %v167_v13  ;;  %v1357_v17 = vpop.f32.mrb[7].mxu1  ;;  %v1090_v13 = vld [vmem:[%s1823_s6 + $0x10] sm:$0xff]  ;;  %v1467_v15 = vpack.c.bf16 %v1089_v12, %v1088_v11 }
 0xec3   :  { %v777_v19 = vmul.f32 0.5, %v776_v16 }
 0xec5   :  { %v778_v20 = vsel %vm1624_vm4, %v776_v16, %v777_v19  ;;  %v1091_v16 = vld [vmem:[%s1823_s6 + $0x18] sm:$0xff] }
 0xec6   :  { %1497 = vtanh.f32 %v778_v20  ;;  %v1470_v17 = vpack.c.bf16 %v1091_v16, %v1090_v13 }
 0xed0   :  { %v1498_v9 = vpop.eup %1497 }
 0xed1   :  { %v780_v21 = vmul.f32 0.5, %v1498_v9 }
 0xed3   :  { %v781_v22 = vadd.f32 0.5, %v780_v21  ;;  %v1092_v21 = vld [vmem:[%s1823_s6 + $0x20] sm:$0xff] }
 0xed5   :  { %v782_v23 = vsel %vm1624_vm4, %v1498_v9, %v781_v22  ;;  %v13_v22 = vstv %s1824_s7 }
 0xed6   :  { %785 = vrot.lane.b32.xlu0 %v782_v23, %s1516_s2  ;;  %v783_v5 = vmul.f32 %v782_v23, %v692_v3  ;;  %v1005_v3 = vld [vmem:[%s1822_s4 + $0x18] sm:$0xff]  ;;  %14 = vst [vmem:[#allocation3] sm:$0x1] %v13_v22 }
 0xed7   :  { %v1464_v6 = vpack.c.bf16 %v1005_v3, %v1004_v25 }
 0xf48   :  { %v786_v14 = vpop.permute.xlu0 %785 }
 0xf49   :  { %v788_v24 = vmul.f32 %v786_v14, %v782_v23 }
 0xf4b   :  { %790 = vrot.lane.b32.xlu1 %v788_v24, %s1517_s25  ;;  %v1206_v24 = vld [vmem:[#allocation3] ss:$0 sm:$0xff] }
 0xfbd   :  { %v791_v26 = vpop.permute.xlu1 %790 }
 0xfbe   :  { %v793_v27 = vadd.f32 %v791_v26, %v783_v5 }
 0xfc0   :  { %1499 = vtanh.f32 %v793_v27 }
 0xfca   :  { %v1500_v28 = vpop.eup %1499 }
 0xfcb   :  { %796 = vrot.lane.b32.xlu0 %v1500_v28, %s1516_s2 }
0x103d   :  { %v797_v29 = vpop.permute.xlu0 %796 }
0x103e   :  { %v799_v30 = vmul.f32 %v797_v29, %v782_v23 }
0x1040   :  { %803 = vrot.lane.b32.xlu1 %v799_v30, %s1517_s25 }
0x10b2   :  { %v804_v31 = vpop.permute.xlu1 %803 }
0x10b3   :  { %1367 = vmatmul.mubr.msk.f32.vlgmr.msra.gmra.mrb[12].mxu0 %vm50_vm0, %v804_v31 }
0x10b4   :  { %1388 = vmatprep.mubr.msk.f32.mxu0 %vm1514_vm1, %v1515_v4  ;;  %1462 = vmatpush3.bf16.msra.mxu0 %v1461_v1 }
0x10b5   :  { %1463 = vmatprep.subr.bf16.mxu0 %v1513_v2 }
0x10b8   :  { %1465 = vmatpush3.bf16.msra.mxu0 %v1464_v6 }
0x1186   :  { %v873_v33 = vpop.f32.mrb[12].mxu0 }
0x1187   :  { %v877_v34 = vadd.f32 %v873_v33, %v172_v32  ;;  %v1368_v35 = vpop.f32.mrb[13].mxu0 }
0x1189   :  { %v878_v36 = vmul.f32 0.5, %v877_v34 }
0x118b   :  { %v879_v37 = vsel %vm1624_vm4, %v877_v34, %v878_v36 }
0x118c   :  { %1501 = vtanh.f32 %v879_v37 }
0x1196   :  { %v1502_v38 = vpop.eup %1501 }
0x1197   :  { %v881_v39 = vmul.f32 0.5, %v1502_v38 }
0x1199   :  { %v882_v40 = vadd.f32 0.5, %v881_v39 }
0x119b   :  { %v883_v41 = vsel %vm1624_vm4, %v1502_v38, %v882_v40 }
0x119c   :  { %886 = vrot.lane.b32.xlu0 %v883_v41, %s1516_s2  ;;  %v884_v8 = vmul.f32 %v883_v41, %v793_v27 }
0x120e   :  { %v887_v42 = vpop.permute.xlu0 %886 }
0x120f   :  { %v889_v43 = vmul.f32 %v887_v42, %v883_v41 }
0x1211   :  { %891 = vrot.lane.b32.xlu1 %v889_v43, %s1517_s25 }
0x1283   :  { %v892_v44 = vpop.permute.xlu1 %891 }
0x1284   :  { %v894_v45 = vadd.f32 %v892_v44, %v884_v8 }
0x1286   :  { %1503 = vtanh.f32 %v894_v45 }
0x1290   :  { %v1504_v46 = vpop.eup %1503 }
0x1291   :  { %897 = vrot.lane.b32.xlu0 %v1504_v46, %s1516_s2 }
0x1303   :  { %v898_v47 = vpop.permute.xlu0 %897 }
0x1304   :  { %v900_v48 = vmul.f32 %v898_v47, %v883_v41 }
0x1306   :  { %904 = vrot.lane.b32.xlu1 %v900_v48, %s1517_s25 }
0x1378   :  { %v905_v49 = vpop.permute.xlu1 %904 }
0x1379   :  { %1378 = vmatmul.mubr.msk.f32.vlgmr.msra.gmra.mrb[8].mxu1 %vm50_vm0, %v905_v49 }
0x137a   :  { %1401 = vmatprep.mubr.msk.f32.mxu1 %vm1514_vm1, %v1515_v4  ;;  %1468 = vmatpush3.bf16.msra.mxu1 %v1467_v15 }
0x137b   :  { %1469 = vmatprep.subr.bf16.mxu1 %v1513_v2  ;;  %v1204_v2 = vld [vmem:[%s1825_s5] ss:$0 sm:$0xff] }
0x137e   :  { %1471 = vmatpush3.bf16.msra.mxu1 %v1470_v17 }
0x137f   :  { %1399 = vmatprep.subr.mxu1 %v1515_v4 }
0x1382   :  { %1400 = vmatpush3.msra.mxu1 %v1092_v21 }
0x144c   :  { %v974_v51 = vpop.f32.mrb[8].mxu1 }
0x144d   :  { %v978_v52 = vadd.f32 %v974_v51, %v177_v50  ;;  %v1379_v53 = vpop.f32.mrb[9].mxu1 }
0x144f   :  { %v979_v54 = vmul.f32 0.5, %v978_v52 }
0x1451   :  { %v980_v55 = vsel %vm1624_vm4, %v978_v52, %v979_v54 }
0x1452   :  { %1505 = vtanh.f32 %v980_v55 }
0x145c   :  { %v1506_v56 = vpop.eup %1505 }
0x145d   :  { %v982_v57 = vmul.f32 0.5, %v1506_v56 }
0x145f   :  { %v983_v58 = vadd.f32 0.5, %v982_v57 }
0x1461   :  { %v984_v59 = vsel %vm1624_vm4, %v1506_v56, %v983_v58 }
0x1462   :  { %987 = vrot.lane.b32.xlu0 %v984_v59, %s1516_s2  ;;  %v985_v18 = vmul.f32 %v984_v59, %v894_v45 }
0x14d4   :  { %v988_v60 = vpop.permute.xlu0 %987 }
0x14d5   :  { %v990_v61 = vmul.f32 %v988_v60, %v984_v59 }
0x14d7   :  { %992 = vrot.lane.b32.xlu1 %v990_v61, %s1517_s25 }
0x1549   :  { %v993_v7 = vpop.permute.xlu1 %992 }
0x154a   :  { %v995_v62 = vadd.f32 %v993_v7, %v985_v18 }
0x154c   :  { %1507 = vtanh.f32 %v995_v62 }
0x1556   :  { %v1508_v10 = vpop.eup %1507 }
0x1557   :  { %998 = vrot.lane.b32.xlu0 %v1508_v10, %s1516_s2 }
0x15c9   :  { %v999_v19 = vpop.permute.xlu0 %998 }
0x15ca   :  { %v1001_v20 = vmul.f32 %v999_v19, %v984_v59 }
0x15cc   :  { %1014 = vrot.lane.b32.xlu1 %v1001_v20, %s1517_s25 }
0x163e   :  { %v1015_v9 = vpop.permute.xlu1 %1014 }
0x163f   :  { %1389 = vmatmul.mubr.msk.f32.vlgmr.msra.gmra.mrb[14].mxu0 %vm50_vm0, %v1015_v9 }
0x1712   :  { %v1084_v4 = vpop.f32.mrb[14].mxu0 }
0x1713   :  { %v1085_v23 = vadd.f32 %v1204_v2, %v1084_v4  ;;  %v1390_v14 = vpop.f32.mrb[15].mxu0 }
0x1715   :  { %1402 = vmatmul.mubr.msk.f32.vlgmr.msra.gmra.mrb[10].mxu1 %vm1100_vm5, %v1085_v23 }
0x17e8   :  { %v1170_v5 = vpop.f32.mrb[10].mxu1 }
0x17e9   :  { %v1171_v26 = vadd.f32 %v1206_v24, %v1170_v5  ;;  %v1403_v27 = vpop.f32.mrb[11].mxu1 }
0x17eb   :  { %v1208_v28 = vmul.f32 -1.442695, %v1171_v26 }
0x17ed   :  { %1509 = vpow2.f32 %v1208_v28 }
0x17f7   :  { %v1510_v29 = vpop.eup %1509 }
0x17f8   :  { %v1177_v30 = vadd.f32 1.0, %v1510_v29 }
0x17fa   :  { %1511 = vrcp.f32 %v1177_v30 }
0x1804   :  { %v1512_v31 = vpop.eup %1511 }
0x1805   :  { %v1180_v32 = vmul.f32 9.0, %v1512_v31 }
0x1807   :  { %v1181_v33 = vadd.f32 1.0, %v1180_v32 }
0x1809   :  { %1183 = vst.msk [vmem:[%s1826_s8] sm:$0xff] %vm1182_vm6, %v1181_v33 }

</bundles_post_ra>
